<compile_context>
chip_gen: v5e
topology: v5e:2x2
jax: 0.10.0
libtpu: 0.0.40
codegen_flags: <defaults>
</compile_context>

<pallas_src>
import functools

import jax
import jax.numpy as jnp
from jax import lax
from jax.experimental import pallas as pl
from jax.experimental.pallas import tpu as pltpu


def _round_up(x, m):
    return ((x + m - 1) // m) * m


def ordinal_mse_kernel(x_ref, rating_ref, out_ref, *, ragged):
    # x_ref:      [C, TB]  input dtype (class-major, lane-dense)          VMEM
    # rating_ref: [1, TB]  int8; padded / never-DMA'd columns carry -1    VMEM
    # out_ref:    [8, 128] f32, one disjoint block per grid step          VMEM
    x = x_ref[...].astype(jnp.float32)        # upcast after load (bf16-friendly, v5e-safe)
    r = rating_ref[...].astype(jnp.int32)     # (1, TB)
    C, TB = x.shape

    # diff[c, b] = x - gt with gt = (c <= rating[b]); gt is folded into the select
    # instead of being materialized + cast + subtracted.
    cls = lax.broadcasted_iota(jnp.int32, (C, TB), 0)   # class index on the sublane axis
    diff = jnp.where(cls <= r, x - 1.0, x)
    sq = diff * diff

    if ragged:
        # Only generated when B % tb != 0.  Columns past B were never DMA'd (their x
        # is undefined, possibly NaN/Inf) but their rating is a defined -1 sentinel:
        # select-to-zero (never multiply) so garbage cannot propagate into the sum.
        sq = jnp.where(r >= 0, sq, 0.0)

    partial = jnp.sum(sq)                     # cross-lane XLU reduce: free under the DMA

    # Store the scalar partial into element [0, 0] of this tile's disjoint block.
    rows = lax.broadcasted_iota(jnp.int32, out_ref.shape, 0)
    cols = lax.broadcasted_iota(jnp.int32, out_ref.shape, 1)
    out_ref[...] = jnp.where((rows == 0) & (cols == 0), partial, 0.0)


def _vmem_capacity_bytes():
    try:
        return int(pltpu.get_tpu_info().vmem_capacity_bytes)
    except Exception:
        return 64 * 1024 * 1024               # conservative: v7x per-TensorCore VMEM


def _dense_loss(x, rating, num_classes, class_major):
    # Fused pure-JAX fast path for small batches (same semantics as the kernel).
    xf = x.astype(jnp.float32)
    r = rating.astype(jnp.int32)
    cls = jnp.arange(num_classes, dtype=jnp.int32)
    if class_major:
        gt = (cls[:, None] <= r[None, :]).astype(jnp.float32)
    else:
        gt = (cls[None, :] <= r[:, None]).astype(jnp.float32)
    return jnp.mean((xf - gt) ** 2)


def ordinal_mse_loss(input_ordinal_dist, rating, num_classes, *,
                     class_major=False, tile_b=None, min_kernel_batch=32768):
    """OrdinalMSELoss forward.

    input_ordinal_dist: [batch, num_classes] (or [num_classes, batch] if class_major=True)
    rating:             [batch] integer class indices in [0, num_classes-1]
    Returns a scalar float32 loss = mean((input - class_encoding[rating])**2).
    """
    if class_major:
        C, B = input_ordinal_dist.shape
    else:
        B, C = input_ordinal_dist.shape
    assert C == num_classes
    assert num_classes <= 127, "rating is carried as int8"
    rating = rating.reshape(-1)

    # Small-B fast path: grid-step + launch overhead beats the kernel at tiny batch.
    if B < min_kernel_batch:
        return _dense_loss(input_ordinal_dist, rating, num_classes, class_major)

    # Class-major (lane-dense) layout.  Free when the caller already supplies [C, B];
    # otherwise the transpose is the single remaining pre-kernel HBM copy (the pad
    # that used to accompany it is gone -- the ragged tail is masked in-kernel).
    x_t = input_ordinal_dist if class_major else jnp.transpose(input_ordinal_dist, (1, 0))

    # Generation-aware tile size (lanes = batch elements per grid step).
    big_vmem = _vmem_capacity_bytes() >= 96 * 1024 * 1024   # v5e/v6e: 128 MiB; v7x: 64 MiB
    cap = 262144 if big_vmem else 131072
    vmem_limit = (48 if big_vmem else 32) * 1024 * 1024

    if B <= 128:
        tb = B                                 # single exact block (block == full extent)
    else:
        b128 = _round_up(B, 128)
        if tile_b is not None:
            tb = min(_round_up(tile_b, 128), cap, b128)
        else:
            tb = min(cap, b128)
            if tb == b128 and B > 65536:
                # Split into >= 2 tiles so the "parallel" axis engages both v7x TCs.
                tb = _round_up((B + 1) // 2, 128)
    num_tiles = (B + tb - 1) // tb
    b_pad = num_tiles * tb
    ragged = b_pad != B

    # Tiny int8 rating row, padded with -1 so the kernel can mask the ragged tail.
    r_row = jnp.pad(rating.astype(jnp.int8), (0, b_pad - B),
                    constant_values=-1).reshape(1, b_pad)

    kernel = functools.partial(ordinal_mse_kernel, ragged=ragged)
    partials = pl.pallas_call(
        kernel,
        out_shape=jax.ShapeDtypeStruct((num_tiles * 8, 128), jnp.float32),
        grid_spec=pltpu.PrefetchScalarGridSpec(
            num_scalar_prefetch=0,
            grid=(num_tiles,),
            in_specs=[
                pl.BlockSpec((C, tb), lambda i: (0, i)),   # x tile: all classes, tb lanes
                pl.BlockSpec((1, tb), lambda i: (0, i)),   # int8 rating tile (always full)
            ],
            out_specs=pl.BlockSpec((8, 128), lambda i: (i, 0)),  # disjoint per-tile blocks
        ),
        compiler_params=pltpu.CompilerParams(
            dimension_semantics=("parallel",),   # shards tiles across both TCs on v7x
            vmem_limit_bytes=vmem_limit,
        ),
    )(x_t, r_row)

    # Tiny finalize in the wrapper: sum of per-tile partial sums, single divide.
    return jnp.sum(partials) / jnp.float32(B * C)


def _torch_reference(x, rating, num_classes):
    # Pure-JAX reference mirroring the PyTorch module (class_encoding = lower-tri ones).
    enc = jnp.tril(jnp.ones((num_classes, num_classes), jnp.float32))
    gt = enc[rating]
    return jnp.mean((x.astype(jnp.float32) - gt) ** 2)


if __name__ == "__main__":
    key = jax.random.PRNGKey(0)

    # Small shapes matching the module's forward: [batch, num_classes] + [batch].
    batch, num_classes = 8, 5
    k1, k2 = jax.random.split(key)
    x = jax.random.normal(k1, (batch, num_classes), jnp.float32)
    rating = jax.random.randint(k2, (batch,), 0, num_classes, dtype=jnp.int32)

    # Force the Pallas kernel even at tiny batch (min_kernel_batch=0).
    loss = jax.block_until_ready(
        ordinal_mse_loss(x, rating, num_classes, min_kernel_batch=0))
    ref = _torch_reference(x, rating, num_classes)
    assert jnp.allclose(loss, ref, rtol=1e-5, atol=1e-6), (loss, ref)

    # Multi-tile ragged path: 3 grid steps with a 128-lane tile; last tile is masked
    # in-kernel (no pre-kernel pad of x).
    batch2 = 300
    k3, k4 = jax.random.split(k1)
    x2 = jax.random.normal(k3, (batch2, num_classes), jnp.float32)
    rating2 = jax.random.randint(k4, (batch2,), 0, num_classes, dtype=jnp.int32)
    loss2 = jax.block_until_ready(
        ordinal_mse_loss(x2, rating2, num_classes, tile_b=128, min_kernel_batch=0))
    ref2 = _torch_reference(x2, rating2, num_classes)
    assert jnp.allclose(loss2, ref2, rtol=1e-5, atol=1e-6), (loss2, ref2)

    # Zero-transpose API: producer supplies the class-major [C, B] layout directly.
    x2_cm = jnp.transpose(x2, (1, 0))
    loss3 = jax.block_until_ready(
        ordinal_mse_loss(x2_cm, rating2, num_classes, class_major=True,
                         tile_b=128, min_kernel_batch=0))
    assert jnp.allclose(loss3, ref2, rtol=1e-5, atol=1e-6), (loss3, ref2)

    # Small-B fast path (pure JAX, no pallas_call) still matches.
    loss4 = jax.block_until_ready(ordinal_mse_loss(x, rating, num_classes))
    assert jnp.allclose(loss4, ref, rtol=1e-5, atol=1e-6), (loss4, ref)

    print("KERNEL_OK")
</pallas_src>

<mosaic_0001>
module attributes {stable_mosaic.version = 11 : i64} {
  func.func @ordinal_mse_kernel(%arg0: i32, %arg1: memref<5x8xf32, #tpu.memory_space<vmem>>, %arg2: memref<1x8xi8, #tpu.memory_space<vmem>>, %arg3: memref<8x128xf32, #tpu.memory_space<vmem>>) attributes {dimension_semantics = [#tpu.dimension_semantics<parallel>], iteration_bounds = array<i64: 1>, scalar_prefetch = 0 : i64, scratch_operands = 0 : i64, tpu.core_type = #tpu.core_type<tc>, window_params = [{transform_indices = @transform_0, window_bounds = array<i64: 5, 8>}, {transform_indices = @transform_1, window_bounds = array<i64: 1, 8>}, {transform_indices = @transform_2, window_bounds = array<i64: 8, 128>}]} {
    %c0 = arith.constant 0 : index
    %c0_0 = arith.constant 0 : index
    %0 = vector.load %arg1[%c0, %c0_0] : memref<5x8xf32, #tpu.memory_space<vmem>>, vector<5x8xf32>
    %c0_1 = arith.constant 0 : index
    %c0_2 = arith.constant 0 : index
    %1 = vector.load %arg2[%c0_1, %c0_2] : memref<1x8xi8, #tpu.memory_space<vmem>>, vector<1x8xi8>
    %2 = arith.extsi %1 : vector<1x8xi8> to vector<1x8xi32>
    %3 = tpu.iota {dimensions = array<i32: 0>} : vector<5x8xi32>
    %4 = vector.broadcast %2 : vector<1x8xi32> to vector<5x8xi32>
    %5 = arith.cmpi sle, %3, %4 : vector<5x8xi32>
    %cst = arith.constant 1.000000e+00 : f32
    %6 = vector.broadcast %cst : f32 to vector<5x8xf32>
    %7 = arith.subf %0, %6 : vector<5x8xf32>
    %8 = arith.select %5, %7, %0 : vector<5x8xi1>, vector<5x8xf32>
    %9 = arith.mulf %8, %8 : vector<5x8xf32>
    %10 = vector.shape_cast %9 : vector<5x8xf32> to vector<1x5x8xf32>
    %cst_3 = arith.constant dense<0.000000e+00> : vector<1xf32>
    %11 = vector.multi_reduction <add>, %10, %cst_3 [1, 2] : vector<1x5x8xf32> to vector<1xf32>
    %12 = vector.shape_cast %11 : vector<1xf32> to vector<1x1x1xf32>
    %13 = vector.extract %12[0, 0, 0] : f32 from vector<1x1x1xf32>
    %14 = tpu.iota {dimensions = array<i32: 0>} : vector<8x128xi32>
    %15 = tpu.iota {dimensions = array<i32: 1>} : vector<8x128xi32>
    %c0_i32 = arith.constant 0 : i32
    %16 = vector.broadcast %c0_i32 : i32 to vector<8x128xi32>
    %17 = arith.cmpi eq, %14, %16 : vector<8x128xi32>
    %c0_i32_4 = arith.constant 0 : i32
    %18 = vector.broadcast %c0_i32_4 : i32 to vector<8x128xi32>
    %19 = arith.cmpi eq, %15, %18 : vector<8x128xi32>
    %20 = arith.andi %17, %19 : vector<8x128xi1>
    %cst_5 = arith.constant 0.000000e+00 : f32
    %21 = vector.broadcast %13 : f32 to vector<8x128xf32>
    %22 = vector.broadcast %cst_5 : f32 to vector<8x128xf32>
    %23 = arith.select %20, %21, %22 : vector<8x128xi1>, vector<8x128xf32>
    %c0_6 = arith.constant 0 : index
    %c0_7 = arith.constant 0 : index
    %24 = vector.load %arg3[%c0_6, %c0_7] : memref<8x128xf32, #tpu.memory_space<vmem>>, vector<8x128xf32>
    tpu.vector_store %arg3[%c0_6, %c0_7], %23 {strides = array<i32>} : memref<8x128xf32, #tpu.memory_space<vmem>>, vector<8x128xf32>,
    return
  }
  func.func @transform_0(%arg0: i32) -> (i32, i32) {
    %c0_i32 = arith.constant 0 : i32
    %c0_i32_0 = arith.constant 0 : i32
    return %c0_i32, %arg0 : i32, i32
  }
  func.func @transform_1(%arg0: i32) -> (i32, i32) {
    %c0_i32 = arith.constant 0 : i32
    %c0_i32_0 = arith.constant 0 : i32
    return %c0_i32, %arg0 : i32, i32
  }
  func.func @transform_2(%arg0: i32) -> (i32, i32) {
    %c0_i32 = arith.constant 0 : i32
    %c0_i32_0 = arith.constant 0 : i32
    return %arg0, %c0_i32 : i32, i32
  }
}

</mosaic_0001>

<bundles_post_ra>
// kernel: tpu_custom_call.1
= control target key start
LH: loop header
LB: loop body
LE: loop exit
PB: predicated region body
PF: predicated region fallthrough
CT: control target
= control target key end

     0   :  { %7 = vsyncpa [#allocation3], 0  ;;  %s198_s0 = inlined_call_operand.hbm [shape: f32[5,8], index: 0, kind: input, shape index: {}]   ;;  %s199_s1 = inlined_call_operand.hbm [shape: s8[1,8], index: 1, kind: input, shape index: {}]   ;;  %s200_s2 = inlined_call_operand.hbm [shape: f32[8,128], index: 2, kind: output, shape index: {}]  }
   0x1   :  { %8 = vsyncpa [#allocation6], 0 }
   0x2   :  { %9 = vsyncpa [#allocation4], 0  ;;  %s15_s11 = sshll.u32 %s198_s0, 4  ;;  %s171_s12 = smov [#allocation2]   ;;  %s16_s11 = int_to_ptr.hbm [resolvable:$true] %s15_s11 }
   0x3   :  { %s17_s13 = sshll.u32 %s171_s12, 4  ;;  %s26_s16 = sshll.u32 %s199_s1, 4  ;;  %s18_s13 = int_to_ptr.vmem [resolvable:$true] %s17_s13  ;;  %s27_s16 = int_to_ptr.hbm [resolvable:$true] %s26_s16 }
   0x4   :  { %20 = dma.hbm_to_vmem [thread:$0]  %s16_s11, 128, %s18_s13, [#allocation3]  }
   0x5   :  { %s172_s17 = smov [#allocation5]  }
   0x6   :  { %s28_s18 = sshll.u32 %s172_s17, 4  ;;  %s29_s18 = int_to_ptr.vmem [resolvable:$true] %s28_s18 }
   0x7   :  { %31 = dma.hbm_to_vmem [thread:$0]  %s27_s16, 16, %s29_s18, [#allocation6]  }
   0x8   :  { %165 = dma.done.wait [#allocation3], 128  }
   0x9   :  { %166 = vsyncadd [#allocation3], 4294967168 }
   0xa   :  { %167 = dma.done.wait [#allocation6], 16  }
   0xb   :  { %168 = vsyncadd [#allocation6], 4294967280  ;;  %v43_v0 = vlaneseq  ;;  %v40_v1 = vld [vmem:[#allocation2] sm:$0x1f]  ;;  %v41_v2 = vld [vmem:[#allocation5] sm:$0x1] }
   0xc   :  { %v42_v3 = vunpack.c.0.s8 %v41_v2  ;;  %v87_v5 = vadd.f32 -1.0, %v40_v1  ;;  %vm50_vm1 = vcmask 61440   ;;  %s173_s0 = smov [#allocation7]   ;;  %s76_s21 = sshll.u32 %s200_s2, 4  ;;  %s77_s21 = int_to_ptr.hbm [resolvable:$true] %s76_s21 }
   0xd   :  { %v44_v4 = vshrl.u32 %v43_v0, 7  ;;  %v62_v17 = vand.u32 127, %v43_v0  ;;  %s74_s1 = sshll.u32 %s173_s0, 4  ;;  %s75_s1 = int_to_ptr.vmem [resolvable:$true] %s74_s1 }
   0xe   :  { %v45_v6 = vperm.slane %v42_v3, 0 }
   0xf   :  { %vm63_vm2 = vcmp.eq.s32.totalorder %v44_v4, 0  ;;  %vm64_vm3 = vcmp.eq.s32.totalorder %v62_v17, 0 }
  0x10   :  { %vm46_vm0 = vcmp.le.s32.totalorder %v44_v4, %v45_v6  ;;  %vm65_vm4 = vmand %vm63_vm2, %vm64_vm3 }
  0x11   :  { %v48_v7 = vsel %vm46_vm0, %v87_v5, %v40_v1 }
  0x12   :  { %v49_v8 = vmul.f32 %v48_v7, %v48_v7 }
  0x14   :  { %v51_v9 = vsel %vm50_vm1, %v49_v8, 0.0 }
  0x15   :  { %52 = vadd.xlane.f32.xlu0 %v51_v9 }
  0x88   :  { %v53_v10 = vpop.xlane.xlu0 %52 }
  0x89   :  { %v54_v11 = vrot.slane %v53_v10, 4 }
  0x8b   :  { %v55_v12 = vadd.f32 %v54_v11, %v53_v10 }
  0x8d   :  { %v56_v13 = vrot.slane %v55_v12, 2 }
  0x8f   :  { %v57_v14 = vadd.f32 %v56_v13, %v55_v12 }
  0x91   :  { %v58_v15 = vrot.slane %v57_v14, 1 }
  0x93   :  { %v59_v16 = vadd.f32 %v58_v15, %v57_v14 }
  0x95   :  { %88 = vpush %v59_v16 }
  0xc6   :  { %s89_s22 = spop %88 }
  0xc7   :  { %v66_v18 = vstv %s89_s22 }
  0xc8   :  { %v67_v19 = vsel %vm65_vm4, %v66_v18, 0.0 }
  0xc9   :  { %68 = vst [vmem:[#allocation7] sm:$0xff] %v67_v19 }
  0xca   :  { %79 = dma.vmem_to_hbm [thread:$0]  %s75_s1, 128, %s77_s21, [#allocation4]  }
  0xcb   :  { %169 = dma.done.wait [#allocation4], 128  }
  0xcc   :  { %170 = vsyncadd [#allocation4], 4294967168 }
  0xcd   :  { %84 = vsyncpa [#allocation3], 1 }
  0xce   :  { %85 = vsyncpa [#allocation6], 1 }
  0xcf   :  { %86 = vsyncpa [#allocation4], 1 }

</bundles_post_ra>
